<compile_context>
chip_gen: v6e
topology: v6e:2x2x1
jax: 0.10.0
libtpu: 0.0.40
codegen_flags: <defaults>
</compile_context>

<pallas_src>
import functools
import math

import jax
import jax.numpy as jnp
from jax.experimental import pallas as pl
from jax.experimental.pallas import tpu as pltpu


def _angular_loss_kernel(x_ref, w_ref, labels_ref, out_ref,
                         xn_ref, rowsum_ref, coslbl_ref, *,
                         loss_type, s, m, eps):
    c_step = pl.program_id(1)
    n_c_steps = pl.num_programs(1)

    # ---- first C step for this N tile: normalize x rows, zero accumulators ----
    @pl.when(c_step == 0)
    def _init():
        x = x_ref[...].astype(jnp.float32)                              # (nt, D)
        # 1 / max(||x||, 1e-12)  ==  rsqrt(max(||x||^2, 1e-24))
        inv_norm = jax.lax.rsqrt(
            jnp.maximum(jnp.sum(x * x, axis=1, keepdims=True), 1e-24))
        xn_ref[...] = (x * inv_norm).astype(xn_ref.dtype)
        rowsum_ref[...] = jnp.zeros_like(rowsum_ref)
        coslbl_ref[...] = jnp.zeros_like(coslbl_ref)

    # ---- cosine logits for this (N tile, C tile): MXU matmul, f32 accumulate ----
    wf = jax.lax.dot_general(
        xn_ref[...], w_ref[...], (((1,), (1,)), ((), ())),
        preferred_element_type=jnp.float32)                             # (nt, ct)

    nt, ct = wf.shape
    class_ids = c_step * ct + jax.lax.broadcasted_iota(jnp.int32, (nt, ct), 1)
    is_label = class_ids == labels_ref[...]                             # (nt, ct)

    # Online accumulation: full row-sum of exp(s*wf) (the label's term is
    # subtracted exactly at finalize), plus the cosine at the true label.
    rowsum_ref[...] += jnp.sum(jnp.exp(s * wf), axis=1, keepdims=True)
    coslbl_ref[...] += jnp.sum(jnp.where(is_label, wf, 0.0), axis=1, keepdims=True)

    # ---- last C step: margin transform + excluded log-sum-exp + per-row loss ----
    @pl.when(c_step == n_c_steps - 1)
    def _finalize():
        cos_t = coslbl_ref[...]                                         # (nt, 1)
        cos_c = jnp.clip(cos_t, -1.0 + eps, 1.0 - eps)
        if loss_type == 'cosface':
            numerator = s * (cos_t - m)
        elif loss_type == 'arcface':
            # cos(acos(c) + m) == c*cos(m) - sqrt(1 - c^2)*sin(m)  (exact identity)
            sin_t = jnp.sqrt(jnp.maximum(1.0 - cos_c * cos_c, 0.0))
            numerator = s * (cos_c * math.cos(m) - sin_t * math.sin(m))
        else:  # sphereface
            # TODO(synk): relies on Mosaic lowering of arccos; not exercised in the self-test.
            numerator = s * jnp.cos(m * jnp.arccos(cos_c))
        denominator = jnp.exp(numerator) + rowsum_ref[...] - jnp.exp(s * cos_t)
        out_ref[...] = numerator - jnp.log(denominator)                 # (nt, 1)


def _pick_tile(dim, target, align):
    """Largest multiple of `align` that divides `dim` and is <= target, else full dim."""
    if dim <= target:
        return dim
    t = (target // align) * align
    while t >= align:
        if dim % t == 0:
            return t
        t -= align
    return dim


def angular_penalty_sm_loss(x, weight, labels, *, loss_type='arcface',
                            eps=1e-7, s=None, m=None,
                            n_tile=None, c_tile=None):
    loss_type = loss_type.lower()
    assert loss_type in ('arcface', 'sphereface', 'cosface')
    defaults = {'arcface': (64.0, 0.5),
                'sphereface': (64.0, 1.35),
                'cosface': (30.0, 0.4)}
    d_s, d_m = defaults[loss_type]
    s = d_s if s is None else float(s)
    m = d_m if m is None else float(m)

    n, d = x.shape
    c, d2 = weight.shape
    assert d == d2
    assert len(labels) == n

    # Hoisted: L2-normalize the Linear weight rows ONCE (cheap memory-bound XLA
    # op), keep the compute dtype of x so the MXU runs at the native input rate.
    w32 = weight.astype(jnp.float32)
    w_n = (w32 * jax.lax.rsqrt(
        jnp.maximum(jnp.sum(w32 * w32, axis=1, keepdims=True), 1e-24))
           ).astype(x.dtype)

    labels2d = labels.reshape(n, 1).astype(jnp.int32)

    if n_tile is None:
        n_tile = _pick_tile(n, 256, 8)
    else:
        assert n % n_tile == 0
    if c_tile is None:
        c_tile = _pick_tile(c, 1024, 128)
    else:
        assert c % c_tile == 0

    # Rough VMEM budget for the chosen tiles (+ double buffering), clamped.
    itm = jnp.dtype(x.dtype).itemsize
    est = (3 * n_tile * d * itm            # x block (double-buffered) + xn scratch
           + 2 * c_tile * d * itm          # W block (double-buffered)
           + 2 * n_tile * c_tile * 4       # f32 logits / exp working set
           + 8 * n_tile * 128 * 4)         # lane-padded labels/out/accumulators
    vmem_limit = int(min(max(2 * est, 16 << 20), 64 << 20))

    kernel = functools.partial(_angular_loss_kernel,
                               loss_type=loss_type, s=float(s),
                               m=float(m), eps=float(eps))

    per_row = pl.pallas_call(
        kernel,
        out_shape=jax.ShapeDtypeStruct((n, 1), jnp.float32),
        grid_spec=pltpu.PrefetchScalarGridSpec(
            num_scalar_prefetch=0,
            grid=(n // n_tile, c // c_tile),
            in_specs=[
                pl.BlockSpec((n_tile, d), lambda i, cc: (i, 0)),   # x
                pl.BlockSpec((c_tile, d), lambda i, cc: (cc, 0)),  # W (pre-normalized)
                pl.BlockSpec((n_tile, 1), lambda i, cc: (i, 0)),   # labels
            ],
            out_specs=pl.BlockSpec((n_tile, 1), lambda i, cc: (i, 0)),
            scratch_shapes=[
                pltpu.VMEM((n_tile, d), x.dtype),        # normalized x tile
                pltpu.VMEM((n_tile, 1), jnp.float32),    # running sum exp(s*wf)
                pltpu.VMEM((n_tile, 1), jnp.float32),    # cos at true label
            ],
        ),
        compiler_params=pltpu.CompilerParams(
            dimension_semantics=("parallel", "arbitrary"),
            vmem_limit_bytes=vmem_limit),
    )(x, w_n, labels2d)

    # Global mean over the TRUE batch size (correct under N tiling).
    return -jnp.mean(per_row[:, 0])


def _reference(x, weight, labels, *, loss_type='arcface', eps=1e-7, s=None, m=None):
    # Pure-JAX reference mirroring the PyTorch forward, for sanity checking.
    defaults = {'arcface': (64.0, 0.5),
                'sphereface': (64.0, 1.35),
                'cosface': (30.0, 0.4)}
    d_s, d_m = defaults[loss_type]
    s = d_s if s is None else s
    m = d_m if m is None else m
    w_n = weight / jnp.maximum(
        jnp.linalg.norm(weight, axis=1, keepdims=True), 1e-12)
    x_n = x / jnp.maximum(jnp.linalg.norm(x, axis=1, keepdims=True), 1e-12)
    wf = x_n @ w_n.T
    cos_t = wf[jnp.arange(x.shape[0]), labels]
    cos_c = jnp.clip(cos_t, -1.0 + eps, 1.0 - eps)
    if loss_type == 'arcface':
        num = s * jnp.cos(jnp.arccos(cos_c) + m)
    elif loss_type == 'sphereface':
        num = s * jnp.cos(m * jnp.arccos(cos_c))
    else:
        num = s * (cos_t - m)
    onehot = jax.nn.one_hot(labels, wf.shape[1])
    excl_sum = jnp.sum(jnp.exp(s * wf) * (1.0 - onehot), axis=1)
    denom = jnp.exp(num) + excl_sum
    return -jnp.mean(num - jnp.log(denom))


if __name__ == "__main__":
    # Small shapes, chosen so the grid actually has >1 step on both axes
    # (2 N tiles x 2 C tiles) to exercise the online reduction path.
    N, IN_FEATURES, OUT_FEATURES = 16, 128, 256

    key = jax.random.PRNGKey(0)
    kx, kw, kl = jax.random.split(key, 3)

    x = jax.random.normal(kx, (N, IN_FEATURES), dtype=jnp.float32)
    # nn.Linear(in, out, bias=False) weight: (out_features, in_features).
    bound = 1.0 / (IN_FEATURES ** 0.5)
    weight = jax.random.uniform(kw, (OUT_FEATURES, IN_FEATURES),
                                minval=-bound, maxval=bound, dtype=jnp.float32)
    labels = jax.random.randint(kl, (N,), 0, OUT_FEATURES, dtype=jnp.int32)

    for lt in ("arcface", "cosface"):
        loss = angular_penalty_sm_loss(x, weight, labels, loss_type=lt,
                                       n_tile=8, c_tile=128)
        loss = jax.block_until_ready(loss)
        ref = _reference(x, weight, labels, loss_type=lt)
        assert jnp.allclose(loss, ref, rtol=1e-3, atol=1e-3), (lt, loss, ref)

    # Also exercise the auto-tiling path (single tile on each axis).
    loss = jax.block_until_ready(
        angular_penalty_sm_loss(x, weight, labels, loss_type="arcface"))
    ref = _reference(x, weight, labels, loss_type="arcface")
    assert jnp.allclose(loss, ref, rtol=1e-3, atol=1e-3), (loss, ref)

    print("KERNEL_OK")
</pallas_src>

<mosaic_0001>
module attributes {stable_mosaic.version = 11 : i64} {
  func.func @_angular_loss_kernel(%arg0: i32, %arg1: i32, %arg2: memref<8x128xf32, #tpu.memory_space<vmem>>, %arg3: memref<128x128xf32, #tpu.memory_space<vmem>>, %arg4: memref<8x1xi32, #tpu.memory_space<vmem>>, %arg5: memref<8x1xf32, #tpu.memory_space<vmem>>, %arg6: memref<8x128xf32, #tpu.memory_space<vmem>>, %arg7: memref<8x1xf32, #tpu.memory_space<vmem>>, %arg8: memref<8x1xf32, #tpu.memory_space<vmem>>) attributes {dimension_semantics = [#tpu.dimension_semantics<parallel>, #tpu.dimension_semantics<arbitrary>], iteration_bounds = array<i64: 2, 2>, scalar_prefetch = 0 : i64, scratch_operands = 3 : i64, tpu.core_type = #tpu.core_type<tc>, window_params = [{transform_indices = @transform_0, window_bounds = array<i64: 8, 128>}, {transform_indices = @transform_1, window_bounds = array<i64: 128, 128>}, {transform_indices = @transform_2, window_bounds = array<i64: 8, 1>}, {transform_indices = @transform_3, window_bounds = array<i64: 8, 1>}]} {
    %c0_i32 = arith.constant 0 : i32
    %0 = arith.cmpi eq, %arg1, %c0_i32 : i32
    %1 = arith.extui %0 : i1 to i32
    %c0_i32_0 = arith.constant 0 : i32
    %2 = arith.cmpi ne, %1, %c0_i32_0 : i32
    scf.if %2 {
      %c0_19 = arith.constant 0 : index
      %c0_20 = arith.constant 0 : index
      %31 = vector.load %arg2[%c0_19, %c0_20] : memref<8x128xf32, #tpu.memory_space<vmem>>, vector<8x128xf32>
      %32 = arith.mulf %31, %31 : vector<8x128xf32>
      %cst_21 = arith.constant dense<0.000000e+00> : vector<8xf32>
      %33 = vector.multi_reduction <add>, %32, %cst_21 [1] : vector<8x128xf32> to vector<8xf32>
      %34 = vector.shape_cast %33 : vector<8xf32> to vector<8x1xf32>
      %cst_22 = arith.constant 1.000000e-24 : f32
      %35 = vector.broadcast %cst_22 : f32 to vector<8x1xf32>
      %36 = arith.maximumf %34, %35 : vector<8x1xf32>
      %37 = math.rsqrt %36 : vector<8x1xf32>
      %38 = vector.broadcast %37 : vector<8x1xf32> to vector<8x128xf32>
      %39 = arith.mulf %31, %38 : vector<8x128xf32>
      %c0_23 = arith.constant 0 : index
      %c0_24 = arith.constant 0 : index
      %40 = vector.load %arg6[%c0_23, %c0_24] : memref<8x128xf32, #tpu.memory_space<vmem>>, vector<8x128xf32>
      tpu.vector_store %arg6[%c0_23, %c0_24], %39 {strides = array<i32>} : memref<8x128xf32, #tpu.memory_space<vmem>>, vector<8x128xf32>,
      %cst_25 = arith.constant 0.000000e+00 : f32
      %41 = vector.broadcast %cst_25 : f32 to vector<8x1xf32>
      %c0_26 = arith.constant 0 : index
      %c0_27 = arith.constant 0 : index
      %42 = vector.load %arg7[%c0_26, %c0_27] : memref<8x1xf32, #tpu.memory_space<vmem>>, vector<8x1xf32>
      tpu.vector_store %arg7[%c0_26, %c0_27], %41 {strides = array<i32>} : memref<8x1xf32, #tpu.memory_space<vmem>>, vector<8x1xf32>,
      %cst_28 = arith.constant 0.000000e+00 : f32
      %43 = vector.broadcast %cst_28 : f32 to vector<8x1xf32>
      %c0_29 = arith.constant 0 : index
      %c0_30 = arith.constant 0 : index
      %44 = vector.load %arg8[%c0_29, %c0_30] : memref<8x1xf32, #tpu.memory_space<vmem>>, vector<8x1xf32>
      tpu.vector_store %arg8[%c0_29, %c0_30], %43 {strides = array<i32>} : memref<8x1xf32, #tpu.memory_space<vmem>>, vector<8x1xf32>,
    } else {
    }
    %c0 = arith.constant 0 : index
    %c0_1 = arith.constant 0 : index
    %3 = vector.load %arg6[%c0, %c0_1] : memref<8x128xf32, #tpu.memory_space<vmem>>, vector<8x128xf32>
    %c0_2 = arith.constant 0 : index
    %c0_3 = arith.constant 0 : index
    %4 = vector.load %arg3[%c0_2, %c0_3] : memref<128x128xf32, #tpu.memory_space<vmem>>, vector<128x128xf32>
    %cst = arith.constant dense<0.000000e+00> : vector<8x128xf32>
    %5 = tpu.matmul %3, %4, %cst {dimension_numbers = #tpu.dot_dimension_numbers<[1], [1], [0], [0], [0, 0, 1, 0], [], []>} : vector<8x128xf32>, vector<128x128xf32>, vector<8x128xf32> -> vector<8x128xf32>
    %c128_i32 = arith.constant 128 : i32
    %6 = arith.muli %arg1, %c128_i32 : i32
    %7 = tpu.iota {dimensions = array<i32: 1>} : vector<8x128xi32>
    %8 = vector.broadcast %6 : i32 to vector<8x128xi32>
    %9 = arith.addi %8, %7 : vector<8x128xi32>
    %c0_4 = arith.constant 0 : index
    %c0_5 = arith.constant 0 : index
    %10 = vector.load %arg4[%c0_4, %c0_5] : memref<8x1xi32, #tpu.memory_space<vmem>>, vector<8x1xi32>
    %11 = vector.broadcast %10 : vector<8x1xi32> to vector<8x128xi32>
    %12 = arith.cmpi eq, %9, %11 : vector<8x128xi32>
    %c0_6 = arith.constant 0 : index
    %c0_7 = arith.constant 0 : index
    %13 = vector.load %arg7[%c0_6, %c0_7] : memref<8x1xf32, #tpu.memory_space<vmem>>, vector<8x1xf32>
    %cst_8 = arith.constant 6.400000e+01 : f32
    %14 = vector.broadcast %cst_8 : f32 to vector<8x128xf32>
    %15 = arith.mulf %14, %5 : vector<8x128xf32>
    %16 = math.exp %15 : vector<8x128xf32>
    %cst_9 = arith.constant dense<0.000000e+00> : vector<8xf32>
    %17 = vector.multi_reduction <add>, %16, %cst_9 [1] : vector<8x128xf32> to vector<8xf32>
    %18 = vector.shape_cast %17 : vector<8xf32> to vector<8x1xf32>
    %19 = arith.addf %13, %18 : vector<8x1xf32>
    %c0_10 = arith.constant 0 : index
    %c0_11 = arith.constant 0 : index
    %20 = vector.load %arg7[%c0_10, %c0_11] : memref<8x1xf32, #tpu.memory_space<vmem>>, vector<8x1xf32>
    tpu.vector_store %arg7[%c0_10, %c0_11], %19 {strides = array<i32>} : memref<8x1xf32, #tpu.memory_space<vmem>>, vector<8x1xf32>,
    %c0_12 = arith.constant 0 : index
    %c0_13 = arith.constant 0 : index
    %21 = vector.load %arg8[%c0_12, %c0_13] : memref<8x1xf32, #tpu.memory_space<vmem>>, vector<8x1xf32>
    %cst_14 = arith.constant 0.000000e+00 : f32
    %22 = vector.broadcast %cst_14 : f32 to vector<8x128xf32>
    %23 = arith.select %12, %5, %22 : vector<8x128xi1>, vector<8x128xf32>
    %cst_15 = arith.constant dense<0.000000e+00> : vector<8xf32>
    %24 = vector.multi_reduction <add>, %23, %cst_15 [1] : vector<8x128xf32> to vector<8xf32>
    %25 = vector.shape_cast %24 : vector<8xf32> to vector<8x1xf32>
    %26 = arith.addf %21, %25 : vector<8x1xf32>
    %c0_16 = arith.constant 0 : index
    %c0_17 = arith.constant 0 : index
    %27 = vector.load %arg8[%c0_16, %c0_17] : memref<8x1xf32, #tpu.memory_space<vmem>>, vector<8x1xf32>
    tpu.vector_store %arg8[%c0_16, %c0_17], %26 {strides = array<i32>} : memref<8x1xf32, #tpu.memory_space<vmem>>, vector<8x1xf32>,
    %c1_i32 = arith.constant 1 : i32
    %28 = arith.cmpi eq, %arg1, %c1_i32 : i32
    %29 = arith.extui %28 : i1 to i32
    %c0_i32_18 = arith.constant 0 : i32
    %30 = arith.cmpi ne, %29, %c0_i32_18 : i32
    scf.if %30 {
      %c0_19 = arith.constant 0 : index
      %c0_20 = arith.constant 0 : index
      %31 = vector.load %arg8[%c0_19, %c0_20] : memref<8x1xf32, #tpu.memory_space<vmem>>, vector<8x1xf32>
      %cst_21 = arith.constant -0.99999988 : f32
      %cst_22 = arith.constant 0.99999988 : f32
      %32 = vector.broadcast %cst_21 : f32 to vector<8x1xf32>
      %33 = arith.maximumf %32, %31 : vector<8x1xf32>
      %34 = vector.broadcast %cst_22 : f32 to vector<8x1xf32>
      %35 = arith.minimumf %34, %33 : vector<8x1xf32>
      %36 = arith.mulf %35, %35 : vector<8x1xf32>
      %cst_23 = arith.constant 1.000000e+00 : f32
      %37 = vector.broadcast %cst_23 : f32 to vector<8x1xf32>
      %38 = arith.subf %37, %36 : vector<8x1xf32>
      %cst_24 = arith.constant 0.000000e+00 : f32
      %39 = vector.broadcast %cst_24 : f32 to vector<8x1xf32>
      %40 = arith.maximumf %38, %39 : vector<8x1xf32>
      %41 = math.sqrt %40 : vector<8x1xf32>
      %cst_25 = arith.constant 0.87758255 : f32
      %42 = vector.broadcast %cst_25 : f32 to vector<8x1xf32>
      %43 = arith.mulf %35, %42 : vector<8x1xf32>
      %cst_26 = arith.constant 0.47942555 : f32
      %44 = vector.broadcast %cst_26 : f32 to vector<8x1xf32>
      %45 = arith.mulf %41, %44 : vector<8x1xf32>
      %46 = arith.subf %43, %45 : vector<8x1xf32>
      %cst_27 = arith.constant 6.400000e+01 : f32
      %47 = vector.broadcast %cst_27 : f32 to vector<8x1xf32>
      %48 = arith.mulf %47, %46 : vector<8x1xf32>
      %49 = math.exp %48 : vector<8x1xf32>
      %c0_28 = arith.constant 0 : index
      %c0_29 = arith.constant 0 : index
      %50 = vector.load %arg7[%c0_28, %c0_29] : memref<8x1xf32, #tpu.memory_space<vmem>>, vector<8x1xf32>
      %51 = arith.addf %49, %50 : vector<8x1xf32>
      %cst_30 = arith.constant 6.400000e+01 : f32
      %52 = vector.broadcast %cst_30 : f32 to vector<8x1xf32>
      %53 = arith.mulf %52, %31 : vector<8x1xf32>
      %54 = math.exp %53 : vector<8x1xf32>
      %55 = arith.subf %51, %54 : vector<8x1xf32>
      %56 = math.log %55 : vector<8x1xf32>
      %57 = arith.subf %48, %56 : vector<8x1xf32>
      %c0_31 = arith.constant 0 : index
      %c0_32 = arith.constant 0 : index
      %58 = vector.load %arg5[%c0_31, %c0_32] : memref<8x1xf32, #tpu.memory_space<vmem>>, vector<8x1xf32>
      tpu.vector_store %arg5[%c0_31, %c0_32], %57 {strides = array<i32>} : memref<8x1xf32, #tpu.memory_space<vmem>>, vector<8x1xf32>,
    } else {
    }
    return
  }
  func.func @transform_0(%arg0: i32, %arg1: i32) -> (i32, i32) {
    %c0_i32 = arith.constant 0 : i32
    %c0_i32_0 = arith.constant 0 : i32
    return %arg0, %c0_i32 : i32, i32
  }
  func.func @transform_1(%arg0: i32, %arg1: i32) -> (i32, i32) {
    %c0_i32 = arith.constant 0 : i32
    %c0_i32_0 = arith.constant 0 : i32
    return %arg1, %c0_i32 : i32, i32
  }
  func.func @transform_2(%arg0: i32, %arg1: i32) -> (i32, i32) {
    %c0_i32 = arith.constant 0 : i32
    %c0_i32_0 = arith.constant 0 : i32
    return %arg0, %c0_i32 : i32, i32
  }
  func.func @transform_3(%arg0: i32, %arg1: i32) -> (i32, i32) {
    %c0_i32 = arith.constant 0 : i32
    %c0_i32_0 = arith.constant 0 : i32
    return %arg0, %c0_i32 : i32, i32
  }
}

</mosaic_0001>

<bundles_post_ra>
// kernel: tpu_custom_call.1
= control target key start
LH: loop header
LB: loop body
LE: loop exit
PB: predicated region body
PF: predicated region fallthrough
CT: control target
= control target key end

     0   :  { %8 = vsyncpa [#allocation6], 0  ;;  %s936_s0 = inlined_call_operand.vmem [shape: f32[16,128], index: 0, kind: input, shape index: {}]   ;;  %s937_s1 = inlined_call_operand.hbm [shape: f32[256,128], index: 1, kind: input, shape index: {}]   ;;  %s938_s2 = inlined_call_operand.vmem [shape: s32[16,1], index: 2, kind: input, shape index: {}]   ;;  %s939_s3 = inlined_call_operand.vmem [shape: f32[16,1], index: 3, kind: output, shape index: {}]  }
   0x1   :  { %10 = vsyncpa [#allocation6 + $0x1], 0  ;;  %s780_s12 = smov 0   ;;  %s782_s13 = smov 0  }
   0x2   :  { %s784_s14 = smov 0   ;;  %s786_s15 = smov 0  }
   0x3   :  { %s788_s16 = smov 0   ;;  %s790_s17 = smov 0  }
   0x4   :  { %s792_s18 = smov 0   ;;  %s794_s19 = smov 0  }
   0x5 LB: > { %s496_s20 = sadd.s32 4294967295, %s751_s19   ;;  %s25_s21 = sadd.s32 1, %s743_s17  ;;  %s751_s19 = sphi %s794_s19, %s16_s19   ;;  %s747_s18 = sphi %s792_s18, %s949_s18   ;;  %s743_s17 = sphi %s790_s17, %s948_s17   ;;  %s739_s16 = sphi %s788_s16, %s947_s16   ;;  %s735_s15 = sphi %s786_s15, %s946_s15   ;;  %s731_s14 = sphi %s784_s14, %s945_s14   ;;  %s727_s13 = sphi %s782_s13, %s944_s13   ;;  %s723_s12 = sphi %s780_s12, %s943_s12  }
   0x6   : > { %p26_p0 = scmp.ge.s32.totalorder %s25_s21, 2  ;;  %s28_s22 = sadd.s32 1, %s747_s18 }
   0x7   : > { %s61_s23 = sadd.s32 1, %s731_s14  ;;  %p68_p1 = scmp.ne.s32.totalorder %s731_s14, %s727_s13 }
   0x8   : > { %s951_s21 = smov (%p26_p0, %s25_s21), 0  ;;  %s953_s22 = smov (!%p26_p0, %s28_s22), %s747_s18 }
   0x9   : > { %s58_s24 = ssub.s32 %s743_s17, %s951_s21  ;;  %p69_p2 = scmp.eq.s32.totalorder %s751_s19, 0 }
   0xa   : > { %p30_p3 = scmp.ge.s32.totalorder %s953_s22, 2  ;;  %p59_p4 = scmp.eq.s32.totalorder %s58_s24, 0 }
   0xb   : > { %p830_p5 = por %p69_p2, %p68_p1  ;;  %p74_p6 = scmp.ne.s32.totalorder %s727_s13, %s723_s12 }
   0xc   : > { %s955_s22 = smov (%p30_p3, %s953_s22), 0  ;;  %p75_p7 = scmp.eq.s32.totalorder %s496_s20, 0 }
   0xd   : > { %s838_s26 = scalar_select %p59_p4, %s731_s14, %s61_s23  }
   0xe   : > { %p573_p8 = scmp.lt.s32.totalorder %s751_s19, 4  ;;  %s157_s27 = sand.u32 1, %s731_s14  }
   0xf   : > { %p842_p9 = por %p75_p7, %p74_p6  ;;  %s500_s29 = sshll.u32 %s157_s27, 7 }
  0x10   : > { %s514_s30 = sshll.u32 %s743_s17, 11  ;;  %s161_s7 = scalar_lea.vmem [#allocation5], %s500_s29 }
  0x11   : > { %s167_s6 = scalar_lea.hbm %s937_s1, %s514_s30  ;;  %s168_s8 = sshll.u32 %s161_s7, 4  ;;  %s169_s8 = int_to_ptr.vmem [resolvable:$true] %s168_s8 }
  0x12   : > { %p852_p10 = pnand %p573_p8, %p830_p5  ;;  %s158_s10 = scalar_lea.sflag [#allocation6], %s157_s27 }
  0x13   : > { %s670_s11 = scalar_lea.vmem %s169_s8, 2048  ;;  %s753_s12 = smov [#allocation5]  }
  0x14   : > { %p659_p11 = pneg %p852_p10  ;;  %p671_p12 = scmp.ne.s32.totalorder %s169_s8, %s670_s11 }
  0x15   : > { %s675_s20 = sshll.u32 %s753_s12, 4  ;;  %s676_s20 = int_to_ptr.vmem [resolvable:$false] %s675_s20 }
  0x16   : > { %p673_p13 = pnand %p671_p12, %p659_p11  ;;  %s677_s23 = scalar_lea.vmem %s676_s20, 4096 }
  0x17   : > { %p678_p1 = scmp.lt.s32.totalorder %s169_s8, %s676_s20  ;;  %p679_p2 = scmp.lt.s32.totalorder %s677_s23, %s670_s11 }
  0x18   : > { %p674_p0 = pneg %p673_p13 }
  0x19   : > { %p680_p3 = por %p679_p2, %p678_p1 }
  0x1b   : > { %p681_p4 = pnand %p680_p3, %p674_p0 }
  0x1d   : > { %684 = shalt.err (!%p681_p4)
}
  0x1e   : > { %s754_s24 = smov 128   ;;  %s755_s25 = smov 8  }
  0x1f   : > { %572 = dma.hbm_to_vmem [thread:$0]  (!%p852_p10), %s167_s6, 2048, %s169_s8, %s158_s10, %s754_s24, %s754_s24, %s755_s25  }
  0x20   : > { %p503_p5 = scmp.ge.s32.totalorder %s751_s19, 1  ;;  %p183_p6 = scmp.lt.s32.totalorder %s751_s19, 5 }
  0x22   : > { %p184_p7 = pnand %p503_p5, %p183_p6 }
  0x23   : > { %s189_s27 = sand.u32 (!%p184_p7), 1, %s727_s13  }
  0x24   : > { %187 = sbr.rel (%p184_p7) target bundleno = 698 (0x2ba), region = 32  ;;  %s504_s29 = sshll.u32 (!%p184_p7), %s189_s27, 7 }
  0x25   : > { %s190_s30 = scalar_lea.sflag (!%p184_p7), [#allocation6], %s189_s27  ;;  %s863_s4 = scalar_lea.vmem (!%p184_p7), [#allocation5], %s504_s29 }
  0x29   : > { %718 = dma.done.wait (%p842_p9), %s190_s30, 2048  }
  0x2a   : > { %720 = vsyncadd (%p842_p9), %s190_s30, 4294965248  ;;  %p223_p8 = scmp.lt.s32.totalorder %s739_s16, 1  ;;  %p508_p9 = scmp.ne.s32.totalorder %s735_s15, 0 }
  0x2c   : > { %s957_s16 = smov (!%p223_p8, %s739_s16), 1  ;;  %239 = sbr.rel (%p508_p9) target bundleno = 209 (0xd1), region = 40 }
  0x2d   : > { %s871_s5 = sshll.u32 %s957_s16, 3 }
  0x2e   : > { %s226_s8 = scalar_lea.vmem %s936_s0, %s871_s5  ;;  %s231_s11 = scalar_lea.vmem %s938_s2, %s871_s5 }
  0x2f   : > { %s235_s20 = scalar_lea.vmem %s939_s3, %s871_s5 }
  0x31   : > { %v240_v0 = vld [vmem:[%s226_s8] sm:$0xff]  ;;  %vm248_vm0 = vcmask 7168   ;;  %v756_v2 = vmov 0.0  }
  0x32   : > { %v241_v1 = vmul.f32 %v240_v0, %v240_v0  ;;  %249 = vst.msk [vmem:[#allocation3] sm:$0xff] %vm248_vm0, %v756_v2  ;;  %250 = vst.msk [vmem:[#allocation4] sm:$0xff] %vm248_vm0, %v756_v2 }
  0x34   : > { %242 = vadd.xlane.f32.xlu0 %v241_v1 }
  0xbd   : > { %v243_v3 = vpop.xlane.xlu0 %242 }
  0xbe   : > { %v244_v4 = vmax.f32 %v243_v3, 1e-24 }
  0xc0   : > { %644 = vrsqrt.f32 %v244_v4 }
  0xcd   : > { %v645_v5 = vpop.eup %644 }
  0xce   : > { %v246_v6 = vmul.f32 %v645_v5, %v240_v0 }
  0xd0   : > { %247 = vst [vmem:[#allocation2] sm:$0xff] %v246_v6 }
  0xd1 PF: > { %v267_v7 = vld [vmem:[%s863_s4 + $0x78] sm:$0xff]  ;;  %v757_v8 = vmov 0.0   ;;  %vm758_vm1 = vmmov 0   ;;  %v759_v9 = vmov 0   ;;  %v266_v10 = vld [vmem:[%s863_s4 + $0x70] sm:$0xff]  ;;  %v343_v11 = vld [vmem:[%s231_s11] sm:$0xff]  ;;  %v339_v27 = vlaneseq }
  0xd2   : > { %532 = vmatprep.subr.mxu0 %v757_v8  ;;  %564 = vmatprep.mubr.msk.f32.mxu0 %vm758_vm1, %v757_v8  ;;  %v265_v12 = vld [vmem:[%s863_s4 + $0x68] sm:$0xff]  ;;  %v264_v13 = vld [vmem:[%s863_s4 + $0x60] sm:$0xff]  ;;  %v263_v14 = vld [vmem:[%s863_s4 + $0x58] sm:$0xff]  ;;  %s509_s16 = sshll.u32 %s735_s15, 7  ;;  %vm355_vm3 = vcmask 7168   ;;  %p510_p10 = scmp.ne.s32.totalorder %s735_s15, 1 }
  0xd3   : > { %533 = vmatpush3.xpose.msra.mxu0 %v267_v7  ;;  %646 = vset.pattern.permute.xlu0 %v759_v9  ;;  %v262_v15 = vld [vmem:[%s863_s4 + $0x50] sm:$0xff]  ;;  %v261_v16 = vld [vmem:[%s863_s4 + $0x48] sm:$0xff]  ;;  %v260_v17 = vld [vmem:[%s863_s4 + $0x40] sm:$0xff]  ;;  %v340_v28 = vand.u32 127, %v339_v27  ;;  %v341_v29 = vstv %s509_s16 }
  0xd4   : > { %534 = vmatprep.subr.mxu0 %v757_v8  ;;  %345 = vperm.xlu0 %646, %v343_v11   ;;  %v259_v18 = vld [vmem:[%s863_s4 + $0x38] sm:$0xff]  ;;  %v258_v19 = vld [vmem:[%s863_s4 + $0x30] sm:$0xff]  ;;  %v257_v20 = vld [vmem:[%s863_s4 + $0x28] sm:$0xff] }
  0xd5   : > { %v256_v21 = vld [vmem:[%s863_s4 + $0x20] sm:$0xff]  ;;  %v255_v22 = vld [vmem:[%s863_s4 + $0x18] sm:$0xff]  ;;  %v254_v23 = vld [vmem:[%s863_s4 + $0x10] sm:$0xff]  ;;  %v342_v30 = vadd.s32 %v341_v29, %v340_v28 }
  0xd6   : > { %v253_v24 = vld [vmem:[%s863_s4 + $0x8] sm:$0xff]  ;;  %v252_v25 = vld [vmem:[%s863_s4] sm:$0xff]  ;;  %v357_v38 = vld [vmem:[#allocation4] sm:$0xff] }
  0xd7   : > { %535 = vmatpush3.xpose.msra.mxu0 %v266_v10  ;;  %v251_v26 = vld [vmem:[#allocation2] sm:$0xff]  ;;  %v348_v41 = vld [vmem:[#allocation3] sm:$0xff] }
  0xd8   : > { %536 = vmatprep.subr.mxu0 %v757_v8 }
  0xdb   : > { %537 = vmatpush3.xpose.msra.mxu0 %v265_v12 }
  0xdc   : > { %538 = vmatprep.subr.mxu0 %v757_v8 }
  0xdf   : > { %539 = vmatpush3.xpose.msra.mxu0 %v264_v13 }
  0xe0   : > { %540 = vmatprep.subr.mxu0 %v757_v8 }
  0xe3   : > { %541 = vmatpush3.xpose.msra.mxu0 %v263_v14 }
  0xe4   : > { %542 = vmatprep.subr.mxu0 %v757_v8 }
  0xe7   : > { %543 = vmatpush3.xpose.msra.mxu0 %v262_v15 }
  0xe8   : > { %544 = vmatprep.subr.mxu0 %v757_v8 }
  0xeb   : > { %545 = vmatpush3.xpose.msra.mxu0 %v261_v16 }
  0xec   : > { %546 = vmatprep.subr.mxu0 %v757_v8 }
  0xef   : > { %547 = vmatpush3.xpose.msra.mxu0 %v260_v17 }
  0xf0   : > { %548 = vmatprep.subr.mxu0 %v757_v8 }
  0xf3   : > { %549 = vmatpush3.xpose.msra.mxu0 %v259_v18 }
  0xf4   : > { %550 = vmatprep.subr.mxu0 %v757_v8 }
  0xf7   : > { %551 = vmatpush3.xpose.msra.mxu0 %v258_v19 }
  0xf8   : > { %552 = vmatprep.subr.mxu0 %v757_v8 }
  0xfb   : > { %553 = vmatpush3.xpose.msra.mxu0 %v257_v20 }
  0xfc   : > { %554 = vmatprep.subr.mxu0 %v757_v8 }
  0xff   : > { %555 = vmatpush3.xpose.msra.mxu0 %v256_v21 }
 0x100   : > { %556 = vmatprep.subr.mxu0 %v757_v8 }
 0x103   : > { %557 = vmatpush3.xpose.msra.mxu0 %v255_v22 }
 0x104   : > { %558 = vmatprep.subr.mxu0 %v757_v8 }
 0x107   : > { %559 = vmatpush3.xpose.msra.mxu0 %v254_v23 }
 0x108   : > { %560 = vmatprep.subr.mxu0 %v757_v8 }
 0x10b   : > { %561 = vmatpush3.xpose.msra.mxu0 %v253_v24 }
 0x10c   : > { %562 = vmatprep.subr.mxu0 %v757_v8 }
 0x10f   : > { %563 = vmatpush3.xpose.msra.mxu0 %v252_v25 }
 0x112   : > { %565 = vmatmul.mubr.f32.vlgmr.msra.gmra.mxu0 %v251_v26 }
 0x14f   : > { %v346_v31 = vpop.permute.xlu0 %345 }
 0x150   : > { %vm347_vm2 = vcmp.eq.s32.totalorder %v342_v30, %v346_v31 }
 0x1d2   : > { %v334_v32 = vpop.f32.mrf.mxu0 }
 0x1d3   : > { %v349_v33 = vmul.f32 64.0, %v334_v32  ;;  %v358_v34 = vsel %vm347_vm2, %v334_v32, 0.0 }
 0x1d4   : > { %359 = vadd.xlane.f32.xlu1 %v358_v34  ;;  %v566_v35 = vpop.f32.mrf.mxu0 }
 0x1d5   : > { %v350_v36 = vmul.f32 1.442695, %v349_v33 }
 0x1d7   : > { %647 = vpow2.f32 %v350_v36 }
 0x1e4   : > { %v648_v37 = vpop.eup %647 }
 0x1e5   : > { %352 = vadd.xlane.f32.xlu0 %v648_v37 }
 0x25d   : > { %v360_v39 = vpop.xlane.xlu1 %359 }
 0x25e   : > { %v361_v40 = vadd.f32 %v360_v39, %v357_v38 }
 0x260   : > { %362 = vst.msk [vmem:[#allocation4] sm:$0xff] %vm355_vm3, %v361_v40 }
 0x26d   : > { %366 = sbr.rel (%p510_p10) target bundleno = 698 (0x2ba), region = 44 }
 0x26e   : > { %v353_v42 = vpop.xlane.xlu0 %352 }
 0x26f   : > { %v354_v43 = vadd.f32 %v353_v42, %v348_v41 }
 0x271   : > { %356 = vst.msk [vmem:[#allocation3] sm:$0xff] %vm355_vm3, %v354_v43 }
 0x272   : > { %v367_v44 = vld [vmem:[#allocation4] sm:$0xff] }
 0x273   : > { %v511_v45 = vclamps-f32 %v367_v44, 0.9999999  ;;  %v388_v55 = vmul.f32 64.0, %v367_v44 }
 0x275   : > { %v370_v46 = vmul.f32 %v511_v45, %v511_v45  ;;  %v380_v53 = vmul.f32 0.87758255, %v511_v45  ;;  %v389_v58 = vmul.f32 1.442695, %v388_v55 }
 0x277   : > { %v371_v47 = vsub.f32 1.0, %v370_v46 }
 0x278   : > { %v386_v61 = vld [vmem:[#allocation3] sm:$0xff] }
 0x279   : > { %v372_v48 = vmax.f32 %v371_v47, 0.0 }
 0x27b   : > { %649 = vrsqrt.f32 %v372_v48  ;;  %vm375_vm4 = vcmp.eq.f32.partialorder %v372_v48, inf  ;;  %v378_v50 = vand.u32 2147483648, %v372_v48  ;;  %vm377_vm5 = vcmp.eq.f32.partialorder %v372_v48, 0.0 }
 0x27c   : > { %651 = vpow2.f32 %v389_v58 }
 0x288   : > { %v650_v49 = vpop.eup %649 }
 0x289   : > { %v374_v51 = vmul.f32 %v650_v49, %v372_v48  ;;  %v652_v62 = vpop.eup %651 }
 0x28b   : > { %v376_v52 = vsel %vm375_vm4, %v372_v48, %v374_v51 }
 0x28c   : > { %v379_v54 = vsel %vm377_vm5, %v378_v50, %v376_v52 }
 0x28d   : > { %v381_v56 = vmul.f32 0.47942555, %v379_v54 }
 0x28f   : > { %v382_v57 = vsub.f32 %v380_v53, %v381_v56 }
 0x291   : > { %v383_v59 = vmul.f32 64.0, %v382_v57 }
 0x293   : > { %v384_v60 = vmul.f32 1.442695, %v383_v59 }
 0x295   : > { %653 = vpow2.f32 %v384_v60 }
 0x2a2   : > { %v654_v63 = vpop.eup %653 }
 0x2a3   : > { %v387_v0 = vadd.f32 %v654_v63, %v386_v61 }
 0x2a5   : > { %v391_v1 = vsub.f32 %v387_v0, %v652_v62 }
 0x2a7   : > { %655 = vlog2.f32 %v391_v1 }
 0x2b4   : > { %v656_v2 = vpop.eup %655 }
 0x2b5   : > { %v393_v3 = vmul.f32 0.6931472, %v656_v2 }
 0x2b7   : > { %v394_v4 = vsub.f32 %v383_v59, %v393_v3 }
 0x2b9   : > { %395 = vst.msk [vmem:[%s235_s20] sm:$0xff] %vm355_vm3, %v394_v4 }
 0x2ba PF: > { %s16_s19 = sadd.s32 1, %s751_s19   ;;  %s943_s12 = smov %s727_s13 }
 0x2bb   : > { %p13_p11 = scmp.ge.s32.totalorder %s16_s19, 6   ;;  %s944_s13 = smov %s731_s14 }
 0x2bc   : > { %s945_s14 = smov %s838_s26  ;;  %s946_s15 = smov %s743_s17 }
 0x2bd   : > { %s947_s16 = smov %s747_s18  ;;  %s948_s17 = smov %s951_s21 }
 0x2be   : > { %s949_s18 = smov %s955_s22  ;;  %15 = sbr.rel (!%p13_p11) target bundleno = 5 (0x5), region = 86 }
 0x2c3   :  { %415 = vsyncpa [#allocation6], 1 }
 0x2c4   :  { %417 = vsyncpa [#allocation6 + $0x1], 1 }

</bundles_post_ra>
